<compile_context>
chip_gen: v6e
topology: v6e:2x2x1
jax: 0.10.0
libtpu: 0.0.40
codegen_flags: <defaults>
</compile_context>

<pallas_src>
import functools

import jax
import jax.numpy as jnp
import numpy as np
from jax.experimental import pallas as pl
from jax.experimental.pallas import tpu as pltpu


# -----------------------------------------------------------------------------
# Stage 1: fused projection + attention-score precompute (runs once per node).
# -----------------------------------------------------------------------------
def _gat_project_kernel(x_ref, w_ref, a_ref, wh_agg_ref, scores_ref, *, heads, f_out):
    # Fused all-head projection: lane-dense bf16 MXU matmul, f32 accumulation.
    wh = jnp.dot(x_ref[...].astype(jnp.bfloat16), w_ref[...],
                 preferred_element_type=jnp.float32)                  # (T, H*Fo) f32

    # All 2*H score dots fused into one matmul with a block-diagonal (H*Fo, 2H) matrix:
    # column h holds a_src_h, column H+h holds a_trg_h (built once in the wrapper).
    scores_ref[...] = jnp.dot(wh, a_ref[...],
                              preferred_element_type=jnp.float32)     # (T, 2H) f32

    # Emit Wh in bf16, per head, with a fused ones column appended ([Wh_h | 1]) so the
    # attention kernel gets the softmax denominator from the aggregation matmul itself.
    wh_bf = wh.astype(jnp.bfloat16)
    ones = jnp.ones((wh_bf.shape[0], 1), jnp.bfloat16)
    for h in range(heads):                                            # static slices only
        wh_agg_ref[h, :, :f_out] = wh_bf[:, h * f_out:(h + 1) * f_out]
        wh_agg_ref[h, :, f_out:] = ones


# -----------------------------------------------------------------------------
# Stage 2: masked softmax attention + neighbor aggregation over row tiles.
# -----------------------------------------------------------------------------
def _gat_attn_kernel(adj_ref, s_src_ref, s_trg_ref, wh_agg_ref, bias_ref, out_ref,
                     *, heads, f_out, leaky_slope):
    mask = adj_ref[...] != 0                                          # (T, N) bool (int8 in)
    neg = jnp.float32(-1e30)
    s_src_all = s_src_ref[...]                                        # (T, H) f32
    s_trg_all = s_trg_ref[...]                                        # (H, N) f32

    for h in range(heads):
        # Attention logits for this row tile against all neighbors (no in-kernel matmuls
        # or transposes here: both score vectors were precomputed in stage 1).
        e = s_src_all[:, h:h + 1] + s_trg_all[h:h + 1, :]             # (T, N)
        e = jnp.where(e > 0, e, leaky_slope * e)                      # LeakyReLU
        e = jnp.where(mask, e, neg)                                   # mask non-edges

        # Numerically-stable masked softmax numerator (unnormalized).
        m = jnp.max(e, axis=1, keepdims=True)                         # (T, 1)
        p = jnp.where(mask, jnp.exp(e - m), 0.0)                      # (T, N), keep mask-select

        # Aggregation + softmax denominator fused in ONE bf16 MXU matmul against [Wh_h | 1].
        agg = jnp.dot(p.astype(jnp.bfloat16), wh_agg_ref[h],
                      preferred_element_type=jnp.float32)             # (T, Fo+1)
        denom = agg[:, f_out:f_out + 1]                               # (T, 1)
        denom = jnp.where(denom == 0.0, 1.0, denom)                   # isolated nodes -> ELU(bias)
        out_h = agg[:, :f_out] * pl.reciprocal(denom, approx=True)    # EUP reciprocal, (T,Fo) work

        out_h = out_h + bias_ref[h]                                   # (1, Fo) broadcast
        out_h = jnp.where(out_h > 0, out_h, jnp.expm1(out_h))         # ELU (concat=True path)
        # Immediate per-head store: bounds each head's (T,N) temporaries' live range.
        out_ref[:, h * f_out:(h + 1) * f_out] = out_h


def multi_head_gat(x, adj_mask_i8, w_all_bf, a_src, a_trg, bias, *, heads, f_out,
                   leaky_slope=0.2, tile_rows=None):
    """x: (N, Fin) f32; adj_mask_i8: (N, N) int8; w_all_bf: (Fin, H*Fo) bf16 fused/concat
    layout; a_src/a_trg: (H, Fo) f32; bias: (H, Fo) f32.
    Returns (N, H*Fo) f32 -- the PyTorch concat layout directly."""
    n, f_in = x.shape
    hf = heads * f_out
    fo1 = f_out + 1
    assert w_all_bf.shape == (f_in, hf)
    if tile_rows is None:
        tile_rows = n if n <= 128 else 128
    assert n % tile_rows == 0
    grid = (n // tile_rows,)

    # Block-diagonal matrix fusing every head's a_src / a_trg score dots into one matmul.
    a_cat = jnp.zeros((hf, 2 * heads), jnp.float32)
    for h in range(heads):
        a_cat = a_cat.at[h * f_out:(h + 1) * f_out, h].set(a_src[h])
        a_cat = a_cat.at[h * f_out:(h + 1) * f_out, heads + h].set(a_trg[h])
    bias3 = bias.reshape(heads, 1, f_out)

    def _params(vmem_est):
        # Sized to actual residency (with slack for temps), never below defaults-for-demo,
        # never above what v7x (64 MiB physical) can grant.
        return pltpu.CompilerParams(
            dimension_semantics=("parallel",),
            vmem_limit_bytes=int(min(max(3 * vmem_est, 8 << 20), 64 << 20)))

    # ---- Stage 1: Wh (+ fused ones column) and attention scores, computed ONCE per node ----
    proj_est = 2 * (tile_rows * f_in * 4 + f_in * hf * 2 + hf * 2 * heads * 4
                    + heads * tile_rows * fo1 * 2 + tile_rows * 2 * heads * 4)
    wh_agg, scores = pl.pallas_call(
        functools.partial(_gat_project_kernel, heads=heads, f_out=f_out),
        out_shape=(jax.ShapeDtypeStruct((heads, n, fo1), jnp.bfloat16),
                   jax.ShapeDtypeStruct((n, 2 * heads), jnp.float32)),
        grid_spec=pltpu.PrefetchScalarGridSpec(
            num_scalar_prefetch=0, grid=grid,
            in_specs=[
                pl.BlockSpec((tile_rows, f_in), lambda i: (i, 0)),      # node feature tile
                pl.BlockSpec((f_in, hf), lambda i: (0, 0)),             # fused bf16 weights
                pl.BlockSpec((hf, 2 * heads), lambda i: (0, 0)),        # block-diag [a_src|a_trg]
            ],
            out_specs=[
                pl.BlockSpec((heads, tile_rows, fo1), lambda i: (0, i, 0)),
                pl.BlockSpec((tile_rows, 2 * heads), lambda i: (i, 0)),
            ]),
        compiler_params=_params(proj_est),
    )(x, w_all_bf, a_cat)

    # Tiny one-time glue outside any grid loop: split scores; target-side scores go to
    # (H, N) layout so each head's row broadcast needs no in-kernel transpose.
    s_src = scores[:, :heads]                     # (N, H)
    s_trg_t = jnp.transpose(scores[:, heads:])    # (H, N)

    # ---- Stage 2: masked softmax + aggregation, row tiles sharded across TCs ----
    attn_est = (2 * (tile_rows * n + tile_rows * heads * 4 + tile_rows * hf * 4)
                + heads * n * 4 + heads * n * fo1 * 2 + heads * f_out * 4
                + 3 * tile_rows * n * 4)          # + per-head (T,N) f32 temps
    # TODO(synk): for very large N (esp. v7x 64 MiB VMEM), additionally tile the neighbor
    # (column) axis with an online-softmax accumulator and single-buffer the constant
    # inputs (pl.Buffered(1)); the full-row softmax here is exact and fits at these sizes.
    out = pl.pallas_call(
        functools.partial(_gat_attn_kernel, heads=heads, f_out=f_out,
                          leaky_slope=leaky_slope),
        out_shape=jax.ShapeDtypeStruct((n, hf), jnp.float32),
        grid_spec=pltpu.PrefetchScalarGridSpec(
            num_scalar_prefetch=0, grid=grid,
            in_specs=[
                pl.BlockSpec((tile_rows, n), lambda i: (i, 0)),         # int8 adjacency tile
                pl.BlockSpec((tile_rows, heads), lambda i: (i, 0)),     # per-row src scores
                pl.BlockSpec((heads, n), lambda i: (0, 0)),             # per-neighbor trg scores
                pl.BlockSpec((heads, n, fo1), lambda i: (0, 0, 0)),     # bf16 [Wh_h | 1]
                pl.BlockSpec((heads, 1, f_out), lambda i: (0, 0, 0)),   # per-head output bias
            ],
            out_specs=pl.BlockSpec((tile_rows, hf), lambda i: (i, 0)),  # lane-dense concat slab
        ),
        compiler_params=_params(attn_est),
    )(adj_mask_i8, s_src, s_trg_t, wh_agg, bias3)
    return out


def _xavier_uniform(key, shape):
    fan_out, fan_in = shape[-2], shape[-1]
    bound = np.sqrt(6.0 / (fan_in + fan_out))
    return jax.random.uniform(key, shape, jnp.float32, -bound, bound)


def _reference(x, src, trg, w, a_src, a_trg, bias, n_nodes, leaky_slope=0.2):
    """Pure-JAX f32 edge-list reference (gather / scatter_softmax / scatter_add)."""
    outs = []
    for h in range(w.shape[0]):
        wh = x @ w[h]
        nodes, neigh = wh[src], wh[trg]
        score = nodes @ a_src[h] + neigh @ a_trg[h]                   # (E,)
        score = jnp.where(score > 0, score, leaky_slope * score)
        m = jax.ops.segment_max(score, src, num_segments=n_nodes)
        p = jnp.exp(score - m[src])
        denom = jax.ops.segment_sum(p, src, num_segments=n_nodes)
        a_e = p / denom[src]
        out = jax.ops.segment_sum(neigh * a_e[:, None], src, num_segments=n_nodes)
        out = out + bias[h]
        outs.append(jnp.where(out > 0, out, jnp.expm1(out)))
    return jnp.concatenate(outs, axis=1)


if __name__ == "__main__":
    # H*Fo = 128 -> lane-dense output slab (unmasked stores / dense writeback).
    N, F_IN, F_OUT, HEADS = 16, 16, 32, 4

    key = jax.random.PRNGKey(0)
    k_x, k_adj, k_w, k_a = jax.random.split(key, 4)

    # Node features.
    x = jax.random.normal(k_x, (N, F_IN), jnp.float32)

    # Random simple graph with self-loops; int8 dense mask + matching COO edge list.
    adj_bool = jax.random.bernoulli(k_adj, 0.35, (N, N)) | jnp.eye(N, dtype=bool)
    adj_i8 = adj_bool.astype(jnp.int8)
    src_idx, trg_idx = jnp.nonzero(adj_bool)          # COO edge list (reference only)

    # Deterministic parameter init matching the module's __init__ shapes.
    w = _xavier_uniform(k_w, (HEADS, F_IN, F_OUT))                    # per-head weight matrices
    att_raw = _xavier_uniform(k_a, (HEADS, 1, 2 * F_OUT))             # per-head (1, 2*Fo) attention
    a_src = att_raw[:, 0, :F_OUT]                                     # (H, Fo)
    a_trg = att_raw[:, 0, F_OUT:]                                     # (H, Fo)
    bias = jnp.zeros((HEADS, F_OUT), jnp.float32)                     # output bias (zeros init)

    # Fused concat-layout weight matrix, shipped as bf16 (halves weight/Wh traffic).
    w_all_bf = jnp.transpose(w, (1, 0, 2)).reshape(F_IN, HEADS * F_OUT).astype(jnp.bfloat16)

    out = multi_head_gat(x, adj_i8, w_all_bf, a_src, a_trg, bias,
                         heads=HEADS, f_out=F_OUT, leaky_slope=0.2)
    out = jax.block_until_ready(out)

    ref = _reference(x, src_idx, trg_idx, w, a_src, a_trg, bias, N, leaky_slope=0.2)
    # Tolerance relaxed vs the f32 reference for bf16 MXU matmuls + approx reciprocal.
    np.testing.assert_allclose(np.asarray(out), np.asarray(ref), rtol=2e-2, atol=2e-2)

    print("KERNEL_OK")
</pallas_src>

<mosaic_0001>
module attributes {stable_mosaic.version = 11 : i64} {
  func.func @_gat_project_kernel(%arg0: i32, %arg1: memref<16x16xf32, #tpu.memory_space<vmem>>, %arg2: memref<16x128xbf16, #tpu.memory_space<vmem>>, %arg3: memref<128x8xf32, #tpu.memory_space<vmem>>, %arg4: memref<4x16x33xbf16, #tpu.memory_space<vmem>>, %arg5: memref<16x8xf32, #tpu.memory_space<vmem>>) attributes {dimension_semantics = [#tpu.dimension_semantics<parallel>], iteration_bounds = array<i64: 1>, scalar_prefetch = 0 : i64, scratch_operands = 0 : i64, tpu.core_type = #tpu.core_type<tc>, window_params = [{transform_indices = @transform_0, window_bounds = array<i64: 16, 16>}, {pipeline_mode = #tpu.pipeline_mode<synchronous>, transform_indices = @transform_1, window_bounds = array<i64: 16, 128>}, {pipeline_mode = #tpu.pipeline_mode<synchronous>, transform_indices = @transform_2, window_bounds = array<i64: 128, 8>}, {transform_indices = @transform_3, window_bounds = array<i64: 4, 16, 33>}, {transform_indices = @transform_4, window_bounds = array<i64: 16, 8>}]} {
    %c0 = arith.constant 0 : index
    %c0_0 = arith.constant 0 : index
    %0 = vector.load %arg1[%c0, %c0_0] : memref<16x16xf32, #tpu.memory_space<vmem>>, vector<16x16xf32>
    %1 = arith.truncf %0 : vector<16x16xf32> to vector<16x16xbf16>
    %c0_1 = arith.constant 0 : index
    %c0_2 = arith.constant 0 : index
    %2 = vector.load %arg2[%c0_1, %c0_2] : memref<16x128xbf16, #tpu.memory_space<vmem>>, vector<16x128xbf16>
    %cst = arith.constant dense<0.000000e+00> : vector<16x128xf32>
    %3 = tpu.matmul %1, %2, %cst {dimension_numbers = #tpu.dot_dimension_numbers<[1], [0], [0], [1], [0, 0, 1, 1], [], []>} : vector<16x16xbf16>, vector<16x128xbf16>, vector<16x128xf32> -> vector<16x128xf32>
    %c0_3 = arith.constant 0 : index
    %c0_4 = arith.constant 0 : index
    %4 = vector.load %arg3[%c0_3, %c0_4] : memref<128x8xf32, #tpu.memory_space<vmem>>, vector<128x8xf32>
    %cst_5 = arith.constant dense<0.000000e+00> : vector<16x8xf32>
    %5 = tpu.matmul %3, %4, %cst_5 {dimension_numbers = #tpu.dot_dimension_numbers<[1], [0], [0], [1], [0, 0, 1, 1], [], []>} : vector<16x128xf32>, vector<128x8xf32>, vector<16x8xf32> -> vector<16x8xf32>
    %c0_6 = arith.constant 0 : index
    %c0_7 = arith.constant 0 : index
    %6 = vector.load %arg5[%c0_6, %c0_7] : memref<16x8xf32, #tpu.memory_space<vmem>>, vector<16x8xf32>
    tpu.vector_store %arg5[%c0_6, %c0_7], %5 {strides = array<i32>} : memref<16x8xf32, #tpu.memory_space<vmem>>, vector<16x8xf32>,
    %7 = arith.truncf %3 : vector<16x128xf32> to vector<16x128xbf16>
    %cst_8 = arith.constant 1.000000e+00 : bf16
    %8 = vector.broadcast %cst_8 : bf16 to vector<16x1xbf16>
    %9 = vector.extract_strided_slice %7 {offsets = [0, 0], sizes = [16, 32], strides = [1, 1]} : vector<16x128xbf16> to vector<16x32xbf16>
    %c0_9 = arith.constant 0 : index
    %c0_10 = arith.constant 0 : index
    %c0_11 = arith.constant 0 : index
    %10 = vector.load %arg4[%c0_9, %c0_10, %c0_11] : memref<4x16x33xbf16, #tpu.memory_space<vmem>>, vector<1x16x32xbf16>
    %11 = vector.shape_cast %10 : vector<1x16x32xbf16> to vector<16x32xbf16>
    %12 = vector.shape_cast %9 : vector<16x32xbf16> to vector<1x16x32xbf16>
    tpu.vector_store %arg4[%c0_9, %c0_10, %c0_11], %12 {strides = array<i32>} : memref<4x16x33xbf16, #tpu.memory_space<vmem>>, vector<1x16x32xbf16>,
    %c0_12 = arith.constant 0 : index
    %c0_13 = arith.constant 0 : index
    %c32 = arith.constant 32 : index
    %13 = vector.load %arg4[%c0_12, %c0_13, %c32] : memref<4x16x33xbf16, #tpu.memory_space<vmem>>, vector<1x16x1xbf16>
    %14 = vector.shape_cast %13 : vector<1x16x1xbf16> to vector<16x1xbf16>
    %15 = vector.shape_cast %8 : vector<16x1xbf16> to vector<1x16x1xbf16>
    tpu.vector_store %arg4[%c0_12, %c0_13, %c32], %15 {strides = array<i32>} : memref<4x16x33xbf16, #tpu.memory_space<vmem>>, vector<1x16x1xbf16>,
    %16 = vector.extract_strided_slice %7 {offsets = [0, 32], sizes = [16, 32], strides = [1, 1]} : vector<16x128xbf16> to vector<16x32xbf16>
    %c1 = arith.constant 1 : index
    %c0_14 = arith.constant 0 : index
    %c0_15 = arith.constant 0 : index
    %17 = vector.load %arg4[%c1, %c0_14, %c0_15] : memref<4x16x33xbf16, #tpu.memory_space<vmem>>, vector<1x16x32xbf16>
    %18 = vector.shape_cast %17 : vector<1x16x32xbf16> to vector<16x32xbf16>
    %19 = vector.shape_cast %16 : vector<16x32xbf16> to vector<1x16x32xbf16>
    tpu.vector_store %arg4[%c1, %c0_14, %c0_15], %19 {strides = array<i32>} : memref<4x16x33xbf16, #tpu.memory_space<vmem>>, vector<1x16x32xbf16>,
    %c1_16 = arith.constant 1 : index
    %c0_17 = arith.constant 0 : index
    %c32_18 = arith.constant 32 : index
    %20 = vector.load %arg4[%c1_16, %c0_17, %c32_18] : memref<4x16x33xbf16, #tpu.memory_space<vmem>>, vector<1x16x1xbf16>
    %21 = vector.shape_cast %20 : vector<1x16x1xbf16> to vector<16x1xbf16>
    %22 = vector.shape_cast %8 : vector<16x1xbf16> to vector<1x16x1xbf16>
    tpu.vector_store %arg4[%c1_16, %c0_17, %c32_18], %22 {strides = array<i32>} : memref<4x16x33xbf16, #tpu.memory_space<vmem>>, vector<1x16x1xbf16>,
    %23 = vector.extract_strided_slice %7 {offsets = [0, 64], sizes = [16, 32], strides = [1, 1]} : vector<16x128xbf16> to vector<16x32xbf16>
    %c2 = arith.constant 2 : index
    %c0_19 = arith.constant 0 : index
    %c0_20 = arith.constant 0 : index
    %24 = vector.load %arg4[%c2, %c0_19, %c0_20] : memref<4x16x33xbf16, #tpu.memory_space<vmem>>, vector<1x16x32xbf16>
    %25 = vector.shape_cast %24 : vector<1x16x32xbf16> to vector<16x32xbf16>
    %26 = vector.shape_cast %23 : vector<16x32xbf16> to vector<1x16x32xbf16>
    tpu.vector_store %arg4[%c2, %c0_19, %c0_20], %26 {strides = array<i32>} : memref<4x16x33xbf16, #tpu.memory_space<vmem>>, vector<1x16x32xbf16>,
    %c2_21 = arith.constant 2 : index
    %c0_22 = arith.constant 0 : index
    %c32_23 = arith.constant 32 : index
    %27 = vector.load %arg4[%c2_21, %c0_22, %c32_23] : memref<4x16x33xbf16, #tpu.memory_space<vmem>>, vector<1x16x1xbf16>
    %28 = vector.shape_cast %27 : vector<1x16x1xbf16> to vector<16x1xbf16>
    %29 = vector.shape_cast %8 : vector<16x1xbf16> to vector<1x16x1xbf16>
    tpu.vector_store %arg4[%c2_21, %c0_22, %c32_23], %29 {strides = array<i32>} : memref<4x16x33xbf16, #tpu.memory_space<vmem>>, vector<1x16x1xbf16>,
    %30 = vector.extract_strided_slice %7 {offsets = [0, 96], sizes = [16, 32], strides = [1, 1]} : vector<16x128xbf16> to vector<16x32xbf16>
    %c3 = arith.constant 3 : index
    %c0_24 = arith.constant 0 : index
    %c0_25 = arith.constant 0 : index
    %31 = vector.load %arg4[%c3, %c0_24, %c0_25] : memref<4x16x33xbf16, #tpu.memory_space<vmem>>, vector<1x16x32xbf16>
    %32 = vector.shape_cast %31 : vector<1x16x32xbf16> to vector<16x32xbf16>
    %33 = vector.shape_cast %30 : vector<16x32xbf16> to vector<1x16x32xbf16>
    tpu.vector_store %arg4[%c3, %c0_24, %c0_25], %33 {strides = array<i32>} : memref<4x16x33xbf16, #tpu.memory_space<vmem>>, vector<1x16x32xbf16>,
    %c3_26 = arith.constant 3 : index
    %c0_27 = arith.constant 0 : index
    %c32_28 = arith.constant 32 : index
    %34 = vector.load %arg4[%c3_26, %c0_27, %c32_28] : memref<4x16x33xbf16, #tpu.memory_space<vmem>>, vector<1x16x1xbf16>
    %35 = vector.shape_cast %34 : vector<1x16x1xbf16> to vector<16x1xbf16>
    %36 = vector.shape_cast %8 : vector<16x1xbf16> to vector<1x16x1xbf16>
    tpu.vector_store %arg4[%c3_26, %c0_27, %c32_28], %36 {strides = array<i32>} : memref<4x16x33xbf16, #tpu.memory_space<vmem>>, vector<1x16x1xbf16>,
    return
  }
  func.func @transform_0(%arg0: i32) -> (i32, i32) {
    %c0_i32 = arith.constant 0 : i32
    %c0_i32_0 = arith.constant 0 : i32
    return %arg0, %c0_i32 : i32, i32
  }
  func.func @transform_1(%arg0: i32) -> (i32, i32) {
    %c0_i32 = arith.constant 0 : i32
    %c0_i32_0 = arith.constant 0 : i32
    %c0_i32_1 = arith.constant 0 : i32
    return %c0_i32, %c0_i32_0 : i32, i32
  }
  func.func @transform_2(%arg0: i32) -> (i32, i32) {
    %c0_i32 = arith.constant 0 : i32
    %c0_i32_0 = arith.constant 0 : i32
    %c0_i32_1 = arith.constant 0 : i32
    return %c0_i32, %c0_i32_0 : i32, i32
  }
  func.func @transform_3(%arg0: i32) -> (i32, i32, i32) {
    %c0_i32 = arith.constant 0 : i32
    %c0_i32_0 = arith.constant 0 : i32
    %c0_i32_1 = arith.constant 0 : i32
    return %c0_i32, %arg0, %c0_i32_0 : i32, i32, i32
  }
  func.func @transform_4(%arg0: i32) -> (i32, i32) {
    %c0_i32 = arith.constant 0 : i32
    %c0_i32_0 = arith.constant 0 : i32
    return %arg0, %c0_i32 : i32, i32
  }
}

</mosaic_0001>

<bundles_post_ra>
// kernel: tpu_custom_call.1
= control target key start
LH: loop header
LB: loop body
LE: loop exit
PB: predicated region body
PF: predicated region fallthrough
CT: control target
= control target key end

     0   :  { %v334_v1 = vmov 0.0   ;;  %vm335_vm0 = vmmov 0   ;;  %vm30_vm1 = vcmask 130048   ;;  %s453_s0 = inlined_call_operand.vmem [shape: f32[16,16], index: 0, kind: input, shape index: {}]   ;;  %s454_s1 = inlined_call_operand.vmem [shape: bf16[16,128], index: 1, kind: input, shape index: {}]   ;;  %s455_s2 = inlined_call_operand.vmem [shape: f32[128,8], index: 2, kind: input, shape index: {}]   ;;  %s456_s3 = inlined_call_operand.hbm [shape: bf16[4,16,33], index: 3, kind: output, shape index: {0}]   ;;  %s457_s4 = inlined_call_operand.vmem [shape: f32[16,8], index: 4, kind: output, shape index: {1}]  }
   0x1   :  { %v311_v0 = vld [vmem:[%s454_s1] sm:$0xff]   ;;  %262 = vmatprep.subr.bf16.mxu0 %v334_v1  ;;  %v20_v3 = vld [vmem:[%s453_s0 + $0x8] sm:$0xff]  ;;  %v90_v4 = vld [vmem:[%s455_s2 + $0x78] sm:$0xff]  ;;  %264 = vmatprep.mubr.msk.bf16.mxu0 %vm335_vm0, %v334_v1 }
   0x2   :  { %v19_v2 = vld [vmem:[%s453_s0] sm:$0xff]  ;;  %263 = vmatpush3.bf16.msra.mxu0 %v311_v0  ;;  %v89_v6 = vld [vmem:[%s455_s2 + $0x70] sm:$0xff]  ;;  %268 = vmatprep.subr.mxu1 %v90_v4  ;;  %v88_v7 = vld [vmem:[%s455_s2 + $0x68] sm:$0xff] }
   0x3   :  { %v21_v5 = vpack.c.bf16 %v20_v3, %v19_v2  ;;  %269 = vmatpush3.msra.mxu1 %v90_v4  ;;  %v87_v8 = vld [vmem:[%s455_s2 + $0x60] sm:$0xff] }
   0x4   :  { %270 = vmatprep.subr.mxu1 %v89_v6 }
   0x5   :  { %265 = vmatmul.mubr.msk.bf16.vlgmr.msra.gmra.mxu0 %vm30_vm1, %v21_v5  ;;  %271 = vmatpush3.msra.mxu1 %v89_v6 }
   0x6   :  { %10 = vsyncpa [#allocation3], 0  ;;  %272 = vmatprep.subr.mxu1 %v88_v7  ;;  %v86_v9 = vld [vmem:[%s455_s2 + $0x58] sm:$0xff]  ;;  %v85_v10 = vld [vmem:[%s455_s2 + $0x50] sm:$0xff]  ;;  %vm177_vm2 = vcmask 257024   ;;  %vm180_vm3 = vcmask 265472  }
   0x7   :  { %273 = vmatpush3.msra.mxu1 %v88_v7  ;;  %v84_v11 = vld [vmem:[%s455_s2 + $0x48] sm:$0xff]  ;;  %v83_v12 = vld [vmem:[%s455_s2 + $0x40] sm:$0xff]  ;;  %v82_v13 = vld [vmem:[%s455_s2 + $0x38] sm:$0xff]  ;;  %s336_s24 = smov 64   ;;  %s337_s25 = smov 96  }
   0x8   :  { %274 = vmatprep.subr.mxu1 %v87_v8  ;;  %v81_v14 = vld [vmem:[%s455_s2 + $0x30] sm:$0xff]  ;;  %v80_v15 = vld [vmem:[%s455_s2 + $0x28] sm:$0xff]  ;;  %v79_v16 = vld [vmem:[%s455_s2 + $0x20] sm:$0xff]  ;;  %v338_v24 = vmov 1065369472   ;;  %s340_s0 = smov [#allocation2]  }
   0x9   :  { %275 = vmatpush3.msra.mxu1 %v87_v8  ;;  %v78_v17 = vld [vmem:[%s455_s2 + $0x18] sm:$0xff]  ;;  %v77_v18 = vld [vmem:[%s455_s2 + $0x10] sm:$0xff]  ;;  %v76_v19 = vld [vmem:[%s455_s2 + $0x8] sm:$0xff]  ;;  %s221_s26 = sshll.u32 %s340_s0, 4  ;;  %s222_s26 = int_to_ptr.vmem [resolvable:$true] %s221_s26 }
   0xa   :  { %276 = vmatprep.subr.mxu1 %v86_v9  ;;  %v75_v20 = vld [vmem:[%s455_s2] sm:$0xff]  ;;  %s339_s2 = smov 32   ;;  %s312_s27 = scalar_lea.vmem %s222_s26, 512 }
   0xb   :  { %277 = vmatpush3.msra.mxu1 %v86_v9  ;;  %p313_p0 = scmp.ne.s32.totalorder %s222_s26, %s312_s27  ;;  %p317_p1 = scmp.lt.s32.totalorder %s222_s26, %s222_s26 }
   0xc   :  { %278 = vmatprep.subr.mxu1 %v85_v10  ;;  %p318_p2 = scmp.lt.s32.totalorder %s312_s27, %s312_s27 }
   0xd   :  { %279 = vmatpush3.msra.mxu1 %v85_v10 }
   0xe   :  { %280 = vmatprep.subr.mxu1 %v84_v11  ;;  %p319_p3 = por %p318_p2, %p317_p1 }
   0xf   :  { %281 = vmatpush3.msra.mxu1 %v84_v11 }
  0x10   :  { %282 = vmatprep.subr.mxu1 %v83_v12  ;;  %p320_p4 = pnand %p319_p3, %p313_p0 }
  0x11   :  { %283 = vmatpush3.msra.mxu1 %v83_v12 }
  0x12   :  { %284 = vmatprep.subr.mxu1 %v82_v13 }
  0x13   :  { %285 = vmatpush3.msra.mxu1 %v82_v13 }
  0x14   :  { %286 = vmatprep.subr.mxu1 %v81_v14 }
  0x15   :  { %287 = vmatpush3.msra.mxu1 %v81_v14 }
  0x16   :  { %288 = vmatprep.subr.mxu1 %v80_v15 }
  0x17   :  { %289 = vmatpush3.msra.mxu1 %v80_v15 }
  0x18   :  { %290 = vmatprep.subr.mxu1 %v79_v16 }
  0x19   :  { %291 = vmatpush3.msra.mxu1 %v79_v16 }
  0x1a   :  { %292 = vmatprep.subr.mxu1 %v78_v17 }
  0x1b   :  { %293 = vmatpush3.msra.mxu1 %v78_v17 }
  0x1c   :  { %294 = vmatprep.subr.mxu1 %v77_v18 }
  0x1d   :  { %295 = vmatpush3.msra.mxu1 %v77_v18 }
  0x1e   :  { %296 = vmatprep.subr.mxu1 %v76_v19 }
  0x1f   :  { %297 = vmatpush3.msra.mxu1 %v76_v19 }
  0x20   :  { %298 = vmatprep.subr.mxu1 %v75_v20 }
  0x21   :  { %299 = vmatpush3.msra.mxu1 %v75_v20 }
  0xc5   :  { %v68_v21 = vpop.f32.mrf.mxu0 }
  0xc6   :  { %v240_v22 = vpack.c.bf16 %v68_v21, %v68_v21  ;;  %300 = vmatprep.mubr.f32.mxu1 %v68_v21 }
  0xc7   :  { %v266_v23 = vpop.f32.mrf.mxu0 }
  0xc8   :  { %178 = vst.msk [vmem:[#allocation2] sm:$0xf] %vm177_vm2, %v240_v22  ;;  %194 = vrot.lane.b32.xlu1 %v240_v22, %s336_s24  ;;  %183 = vrot.lane.b32.xlu0 %v240_v22, %s337_s25 }
  0xc9   :  { %181 = vst.msk [vmem:[#allocation2] sm:$0xf] %vm180_vm3, %v338_v24  ;;  %v71_v25 = vpop.f32.mrf.mxu0 }
  0xca   :  { %v241_v26 = vpack.c.bf16 %v71_v25, %v71_v25  ;;  %301 = vmatmul.mubr.f32.vlgmr.msra.gmra.mxu1 %v71_v25 }
  0xcb   :  { %v267_v27 = vpop.f32.mrf.mxu0 }
  0xcc   :  { %179 = vst.msk [vmem:[#allocation2 + $0x4] sm:$0xf] %vm177_vm2, %v241_v26  ;;  %196 = vrot.lane.b32.xlu1 %v241_v26, %s336_s24  ;;  %185 = vrot.lane.b32.xlu0 %v241_v26, %s337_s25 }
  0xcd   :  { %182 = vst.msk [vmem:[#allocation2 + $0x4] sm:$0xf] %vm180_vm3, %v338_v24 }
  0xd0   :  { %207 = vrot.lane.b32.xlu1 %v241_v26, %s339_s2  ;;  %205 = vrot.lane.b32.xlu0 %v240_v22, %s339_s2 }
 0x13a   :  { %v195_v28 = vpop.permute.xlu1 %194  ;;  %v184_v29 = vpop.permute.xlu0 %183 }
 0x13b   :  { %201 = vst.msk [vmem:[#allocation2 + $0x10] sm:$0xf] %vm177_vm2, %v195_v28  ;;  %190 = vst.msk [vmem:[#allocation2 + $0x8] sm:$0xf] %vm177_vm2, %v184_v29 }
 0x13c   :  { %203 = vst.msk [vmem:[#allocation2 + $0x10] sm:$0xf] %vm180_vm3, %v338_v24  ;;  %192 = vst.msk [vmem:[#allocation2 + $0x8] sm:$0xf] %vm180_vm3, %v338_v24 }
 0x13e   :  { %v197_v30 = vpop.permute.xlu1 %196  ;;  %v186_v31 = vpop.permute.xlu0 %185 }
 0x13f   :  { %202 = vst.msk [vmem:[#allocation2 + $0x14] sm:$0xf] %vm177_vm2, %v197_v30  ;;  %191 = vst.msk [vmem:[#allocation2 + $0xc] sm:$0xf] %vm177_vm2, %v186_v31 }
 0x140   :  { %204 = vst.msk [vmem:[#allocation2 + $0x14] sm:$0xf] %vm180_vm3, %v338_v24  ;;  %193 = vst.msk [vmem:[#allocation2 + $0xc] sm:$0xf] %vm180_vm3, %v338_v24 }
 0x142   :  { %v208_v32 = vpop.permute.xlu1 %207  ;;  %v206_v33 = vpop.permute.xlu0 %205 }
 0x143   :  { %213 = vst.msk [vmem:[#allocation2 + $0x1c] sm:$0xf] %vm177_vm2, %v208_v32  ;;  %212 = vst.msk [vmem:[#allocation2 + $0x18] sm:$0xf] %vm177_vm2, %v206_v33 }
 0x144   :  { %215 = vst.msk [vmem:[#allocation2 + $0x1c] sm:$0xf] %vm180_vm3, %v338_v24  ;;  %214 = vst.msk [vmem:[#allocation2 + $0x18] sm:$0xf] %vm180_vm3, %v338_v24 }
 0x145   :  { %323 = shalt.err (!%p320_p4)
}
 0x146   :  { %s341_s28 = smov 4   ;;  %vm166_vm4 = vcmask 64512  }
 0x147   :  { %227 = dma.vmem_to_hbm [thread:$0]  %s222_s26, 512, %s456_s3, [#allocation3], %s336_s24, %s336_s24, %s341_s28  }
 0x18a   :  { %v302_v34 = vpop.f32.mrf.mxu1 }
 0x18b   :  { %168 = vst.msk [vmem:[%s457_s4 + $0x8] sm:$0xff] %vm166_vm4, %v302_v34 }
 0x18c   :  { %v157_v35 = vpop.f32.mrf.mxu1 }
 0x18d   :  { %167 = vst.msk [vmem:[%s457_s4] sm:$0xff] %vm166_vm4, %v157_v35 }
 0x18e   :  { %332 = dma.done.wait [#allocation3], 512  }
 0x18f   :  { %333 = vsyncadd [#allocation3], 4294966784 }
 0x190   :  { %235 = vsyncpa [#allocation3], 1 }

</bundles_post_ra>
